<compile_context>
chip_gen: v7x
topology: tpu7x:2x2x1
jax: 0.10.0
libtpu: 0.0.40
codegen_flags: <defaults>
</compile_context>

<pallas_src>
import functools

import jax
import jax.numpy as jnp
from jax.experimental import pallas as pl
from jax.experimental.pallas import tpu as pltpu


def _hetero_regressor_kernel(adj_ref, x_ref, wall_ref, bsum_ref, dout_ref,
                             din_ref, gmask_ref, ginv_ref, wreg_ref, breg_ref,
                             out_ref, xw_ref, hg_ref):
    # adj_ref  : (R, TILE_N, N) bf16   A[r, dst_tile, src]
    # x_ref    : (N, Fin)       f32    node features (full)
    # wall_ref : (Fin, R*H)     f32    per-relation weights, concatenated
    # bsum_ref : (1, H)         f32    sum_r b_r
    # dout_ref : (N, R)         f32    rsqrt(out-degree) per (src node, relation)
    # din_ref  : (TILE_N, R)    f32    rsqrt(in-degree)  per (dst node, relation)
    # gmask_ref: (TILE_N, B)    f32    graph membership (0/1), (node, graph)
    # ginv_ref : (B, 1)         f32    1 / (#nodes in graph b)
    # wreg_ref : (H, 1)         f32    regressor weight (transposed Linear weight)
    # breg_ref : (1,)           f32    regressor bias (SMEM)
    # out_ref  : (B, 1)         f32
    # xw_ref   : (R, N, H)      bf16   scratch: pre-scaled XW (built at step 0)
    # hg_ref   : (B, H)         f32    scratch: running per-graph readout sum
    t = pl.program_id(0)
    num_t = pl.num_programs(0)
    R = adj_ref.shape[0]
    TN = adj_ref.shape[1]
    H = xw_ref.shape[2]

    @pl.when(t == 0)
    def _prologue():
        # Fused, lane-dense feature transform for all relations in one MXU pass.
        xw_all = jnp.dot(x_ref[...], wall_ref[...],
                         preferred_element_type=jnp.float32)          # (N, R*H)
        dout = dout_ref[...]                                          # (N, R)
        for r in range(R):  # static unroll (R is small)
            # Pre-scale by rsqrt(out-degree) of the source nodes so the big
            # message matmul below needs no N^2 elementwise work at all.
            xw_r = xw_all[:, r * H:(r + 1) * H] * dout[:, r:r + 1]
            xw_ref[r] = xw_r.astype(xw_ref.dtype)
        hg_ref[...] = jnp.zeros_like(hg_ref)

    # ---- per dst-node-tile work (software-pipelined over the grid) ----
    din = din_ref[...]                                                # (TN, R)
    acc = jnp.zeros((TN, H), dtype=jnp.float32)
    for r in range(R):  # static unroll
        # bf16 adjacency tile straight out of its DMA buffer (read-only) times
        # bf16 pre-scaled XW; MXU accumulates in f32.
        msg = jnp.dot(adj_ref[r], xw_ref[r],
                      preferred_element_type=jnp.float32)             # (TN, H)
        # rsqrt(in-degree) of the destination nodes, applied to the small
        # (TN, H) result instead of the (TN, N) adjacency.
        acc = acc + msg * din[:, r:r + 1]
    # Single folded bias (sum_r b_r) + ReLU.
    h = jnp.maximum(acc + bsum_ref[...], 0.0)                         # (TN, H)

    # Partial graph readout for this tile: hg[b] += sum_{i in tile & graph b} h[i]
    hg_ref[...] += jax.lax.dot_general(
        gmask_ref[...], h,
        dimension_numbers=(((0,), (0,)), ((), ())),
        preferred_element_type=jnp.float32)                           # (B, H)

    @pl.when(t == num_t - 1)
    def _epilogue():
        # dgl.mean_nodes: divide the per-graph sums by node counts, then the
        # nn.Linear(hidden_dim, 1) regressor.
        hg = hg_ref[...] * ginv_ref[...]                              # (B, H)
        out = jnp.dot(hg, wreg_ref[...],
                      preferred_element_type=jnp.float32)             # (B, 1)
        out_ref[...] = out + breg_ref[0]


def hetero_regressor(adj, x, w, b, gmask, ginv, wreg, breg, *, tile_n=None):
    """adj: (R,N,N) f32 0/1 A[r,dst,src]; x: (N,Fin); w: (R,Fin,H); b: (R,H);
    gmask: (B,N) 0/1; ginv: (B,1); wreg: (H,1); breg: (1,1)."""
    R, N, _ = adj.shape
    Fin = x.shape[1]
    Hd = w.shape[2]
    B = gmask.shape[0]

    if tile_n is None:
        # Largest dst-row tile that divides N and keeps the double-buffered
        # bf16 adjacency stream (R * tile_n * N * 2B * 2 bufs) comfortably
        # inside VMEM (sized for v7x's 64 MiB as well as v5e/v6e).
        tile_n = N
        for cand in (512, 256, 128, 64, 32, 16):
            if N % cand == 0:
                tile_n = cand
                break
    assert N % tile_n == 0
    assert tile_n == N or tile_n % 16 == 0  # bf16 sublane tiling

    # Degree normalization precomputed once in the wrapper (one XLA reduce),
    # decoupled from the adjacency tiling inside the kernel.
    # Clamp deg >= 1: equivalent to DGL's pow(deg,-0.5)-with-inf->0 because
    # zero-degree rows/columns contribute zero messages anyway.
    deg_in = jnp.maximum(jnp.sum(adj, axis=2), 1.0)            # (R, N) dst in-deg
    deg_out = jnp.maximum(jnp.sum(adj, axis=1), 1.0)           # (R, N) src out-deg
    din_rs = jax.lax.rsqrt(deg_in).T.astype(jnp.float32)       # (N, R)
    dout_rs = jax.lax.rsqrt(deg_out).T.astype(jnp.float32)     # (N, R)

    adj_bf = adj.astype(jnp.bfloat16)                          # 0/1 exact in bf16
    w_all = jnp.transpose(w, (1, 0, 2)).reshape(Fin, R * Hd)   # (Fin, R*H)
    # Per-relation bias added for every relation unconditionally (matches DGL
    # GraphConv bias + HeteroGraphConv 'sum'); folded into one vector.
    bsum = jnp.sum(b, axis=0, keepdims=True).astype(jnp.float32)   # (1, H)
    gmask_t = jnp.transpose(gmask).astype(jnp.float32)         # (N, B)
    breg_s = jnp.reshape(breg, (1,)).astype(jnp.float32)       # SMEM scalar

    grid = (N // tile_n,)

    fn = pl.pallas_call(
        _hetero_regressor_kernel,
        out_shape=jax.ShapeDtypeStruct((B, 1), jnp.float32),
        grid=grid,
        in_specs=[
            pl.BlockSpec((R, tile_n, N), lambda t: (0, t, 0)),   # adj (bf16)
            pl.BlockSpec((N, Fin), lambda t: (0, 0)),            # x
            pl.BlockSpec((Fin, R * Hd), lambda t: (0, 0)),       # w_all
            pl.BlockSpec((1, Hd), lambda t: (0, 0)),             # bsum
            pl.BlockSpec((N, R), lambda t: (0, 0)),              # rsqrt out-deg
            pl.BlockSpec((tile_n, R), lambda t: (t, 0)),         # rsqrt in-deg tile
            pl.BlockSpec((tile_n, B), lambda t: (t, 0)),         # gmask tile
            pl.BlockSpec((B, 1), lambda t: (0, 0)),              # ginv
            pl.BlockSpec((Hd, 1), lambda t: (0, 0)),             # wreg
            pl.BlockSpec(memory_space=pltpu.MemorySpace.SMEM),   # breg scalar
        ],
        out_specs=pl.BlockSpec((B, 1), lambda t: (0, 0)),
        scratch_shapes=[
            pltpu.VMEM((R, N, Hd), jnp.bfloat16),   # pre-scaled XW per relation
            pltpu.VMEM((B, Hd), jnp.float32),       # running graph readout
        ],
        compiler_params=pltpu.CompilerParams(
            # The dst-tile axis carries the hg accumulation -> reduction axis.
            dimension_semantics=("arbitrary",),
            vmem_limit_bytes=32 * 1024 * 1024,
        ),
    )
    return fn(adj_bf, x, w_all, bsum, dout_rs, din_rs, gmask_t, ginv,
              wreg, breg_s)


def _reference(adj, x, w, b, gmask, ginv, wreg, breg, *, match_kernel_dtypes):
    """Pure-JAX reference. With match_kernel_dtypes=True it mirrors the
    kernel's bf16 adjacency / bf16 pre-scaled-XW quantization."""
    R, N, _ = adj.shape
    H = w.shape[2]
    deg_in = jnp.maximum(adj.sum(axis=2), 1.0)     # (R, N)
    deg_out = jnp.maximum(adj.sum(axis=1), 1.0)    # (R, N)
    a_all = adj
    if match_kernel_dtypes:
        a_all = adj.astype(jnp.bfloat16).astype(jnp.float32)
    acc = jnp.zeros((N, H), jnp.float32)
    for r in range(R):
        xw = (x @ w[r]) * jax.lax.rsqrt(deg_out[r])[:, None]
        if match_kernel_dtypes:
            xw = xw.astype(jnp.bfloat16).astype(jnp.float32)
        acc = acc + (a_all[r] @ xw) * jax.lax.rsqrt(deg_in[r])[:, None]
    h = jnp.maximum(acc + b.sum(axis=0)[None, :], 0.0)
    hg = (gmask @ h) * ginv
    return hg @ wreg + breg


if __name__ == "__main__":
    # Small shapes consistent with the module.
    B = 2          # graphs in the batch
    N = 64         # total nodes (32 per graph)
    R = 3          # number of relations (rel_names)
    IN_DIM = 8     # in_dim
    HID = 32       # hidden_dim
    TILE_N = 32    # dst-node tile -> grid of 2 steps

    key = jax.random.PRNGKey(0)
    k_adj, k_x, k_w, k_b, k_wr = jax.random.split(key, 5)

    # Dense 0/1 adjacency per relation, A[r, dst, src].
    adj = (jax.random.uniform(k_adj, (R, N, N)) > 0.7).astype(jnp.float32)
    x = jax.random.normal(k_x, (N, IN_DIM), dtype=jnp.float32)

    # GraphConv parameters (weight + bias per relation).
    w = 0.1 * jax.random.normal(k_w, (R, IN_DIM, HID), dtype=jnp.float32)
    b = 0.01 * jax.random.normal(k_b, (R, HID), dtype=jnp.float32)

    # Regressor nn.Linear(hidden_dim, 1): stored transposed as (HID, 1).
    wreg = 0.1 * jax.random.normal(k_wr, (HID, 1), dtype=jnp.float32)
    breg = jnp.full((1, 1), 0.05, dtype=jnp.float32)

    # Graph membership: first 32 nodes -> graph 0, last 32 -> graph 1.
    node_graph = jnp.concatenate([jnp.zeros(N // 2, jnp.int32),
                                  jnp.ones(N - N // 2, jnp.int32)])
    gmask = (node_graph[None, :] == jnp.arange(B)[:, None]).astype(jnp.float32)
    ginv = 1.0 / jnp.maximum(gmask.sum(axis=1, keepdims=True), 1.0)   # (B, 1)

    out = hetero_regressor(adj, x, w, b, gmask, ginv, wreg, breg, tile_n=TILE_N)
    jax.block_until_ready(out)
    assert out.shape == (B, 1)

    # Tight check vs. a reference that mirrors the kernel's bf16 quantization.
    ref_match = _reference(adj, x, w, b, gmask, ginv, wreg, breg,
                           match_kernel_dtypes=True)
    assert jnp.allclose(out, ref_match, atol=2e-3, rtol=2e-3), (out, ref_match)

    # Loose sanity check vs. plain f32 math (bf16 adjacency is exact for 0/1
    # values; only the XW rounding differs).
    ref_f32 = _reference(adj, x, w, b, gmask, ginv, wreg, breg,
                         match_kernel_dtypes=False)
    assert jnp.allclose(out, ref_f32, atol=5e-2, rtol=5e-2), (out, ref_f32)

    print("KERNEL_OK")
</pallas_src>

<mosaic_0001>
module attributes {stable_mosaic.version = 11 : i64} {
  func.func @_hetero_regressor_kernel(%arg0: i32, %arg1: memref<3x32x64xbf16, #tpu.memory_space<vmem>>, %arg2: memref<64x8xf32, #tpu.memory_space<vmem>>, %arg3: memref<8x96xf32, #tpu.memory_space<vmem>>, %arg4: memref<1x32xf32, #tpu.memory_space<vmem>>, %arg5: memref<64x3xf32, #tpu.memory_space<vmem>>, %arg6: memref<32x3xf32, #tpu.memory_space<vmem>>, %arg7: memref<32x2xf32, #tpu.memory_space<vmem>>, %arg8: memref<2x1xf32, #tpu.memory_space<vmem>>, %arg9: memref<32x1xf32, #tpu.memory_space<vmem>>, %arg10: memref<1xf32, #tpu.memory_space<smem>>, %arg11: memref<2x1xf32, #tpu.memory_space<vmem>>, %arg12: memref<3x64x32xbf16, #tpu.memory_space<vmem>>, %arg13: memref<2x32xf32, #tpu.memory_space<vmem>>) attributes {dimension_semantics = [#tpu.dimension_semantics<arbitrary>], iteration_bounds = array<i64: 2>, scalar_prefetch = 0 : i64, scratch_operands = 2 : i64, tpu.core_type = #tpu.core_type<tc>, window_params = [{transform_indices = @transform_0, window_bounds = array<i64: 3, 32, 64>}, {pipeline_mode = #tpu.pipeline_mode<synchronous>, transform_indices = @transform_1, window_bounds = array<i64: 64, 8>}, {pipeline_mode = #tpu.pipeline_mode<synchronous>, transform_indices = @transform_2, window_bounds = array<i64: 8, 96>}, {pipeline_mode = #tpu.pipeline_mode<synchronous>, transform_indices = @transform_3, window_bounds = array<i64: 1, 32>}, {pipeline_mode = #tpu.pipeline_mode<synchronous>, transform_indices = @transform_4, window_bounds = array<i64: 64, 3>}, {transform_indices = @transform_5, window_bounds = array<i64: 32, 3>}, {transform_indices = @transform_6, window_bounds = array<i64: 32, 2>}, {pipeline_mode = #tpu.pipeline_mode<synchronous>, transform_indices = @transform_7, window_bounds = array<i64: 2, 1>}, {pipeline_mode = #tpu.pipeline_mode<synchronous>, transform_indices = @transform_8, window_bounds = array<i64: 32, 1>}, {transform_indices = @transform_9, window_bounds = array<i64: 1>}, {pipeline_mode = #tpu.pipeline_mode<synchronous>, transform_indices = @transform_10, window_bounds = array<i64: 2, 1>}]} {
    %c0_i32 = arith.constant 0 : i32
    %0 = arith.cmpi eq, %arg0, %c0_i32 : i32
    %1 = arith.extui %0 : i1 to i32
    %c0_i32_0 = arith.constant 0 : i32
    %2 = arith.cmpi ne, %1, %c0_i32_0 : i32
    scf.if %2 {
      %c0_32 = arith.constant 0 : index
      %c0_33 = arith.constant 0 : index
      %45 = vector.load %arg2[%c0_32, %c0_33] : memref<64x8xf32, #tpu.memory_space<vmem>>, vector<64x8xf32>
      %c0_34 = arith.constant 0 : index
      %c0_35 = arith.constant 0 : index
      %46 = vector.load %arg3[%c0_34, %c0_35] : memref<8x96xf32, #tpu.memory_space<vmem>>, vector<8x96xf32>
      %cst_36 = arith.constant dense<0.000000e+00> : vector<64x96xf32>
      %47 = tpu.matmul %45, %46, %cst_36 {dimension_numbers = #tpu.dot_dimension_numbers<[1], [0], [0], [1], [0, 0, 1, 1], [], []>} : vector<64x8xf32>, vector<8x96xf32>, vector<64x96xf32> -> vector<64x96xf32>
      %c0_37 = arith.constant 0 : index
      %c0_38 = arith.constant 0 : index
      %48 = vector.load %arg5[%c0_37, %c0_38] : memref<64x3xf32, #tpu.memory_space<vmem>>, vector<64x3xf32>
      %49 = vector.extract_strided_slice %47 {offsets = [0, 0], sizes = [64, 32], strides = [1, 1]} : vector<64x96xf32> to vector<64x32xf32>
      %50 = vector.extract_strided_slice %48 {offsets = [0, 0], sizes = [64, 1], strides = [1, 1]} : vector<64x3xf32> to vector<64x1xf32>
      %51 = vector.broadcast %50 : vector<64x1xf32> to vector<64x32xf32>
      %52 = arith.mulf %49, %51 : vector<64x32xf32>
      %53 = arith.truncf %52 : vector<64x32xf32> to vector<64x32xbf16>
      %c0_39 = arith.constant 0 : index
      %c0_40 = arith.constant 0 : index
      %c0_41 = arith.constant 0 : index
      %54 = vector.load %arg12[%c0_39, %c0_40, %c0_41] : memref<3x64x32xbf16, #tpu.memory_space<vmem>>, vector<1x64x32xbf16>
      %55 = vector.shape_cast %54 : vector<1x64x32xbf16> to vector<64x32xbf16>
      %56 = vector.shape_cast %53 : vector<64x32xbf16> to vector<1x64x32xbf16>
      tpu.vector_store %arg12[%c0_39, %c0_40, %c0_41], %56 {strides = array<i32>} : memref<3x64x32xbf16, #tpu.memory_space<vmem>>, vector<1x64x32xbf16>,
      %57 = vector.extract_strided_slice %47 {offsets = [0, 32], sizes = [64, 32], strides = [1, 1]} : vector<64x96xf32> to vector<64x32xf32>
      %58 = vector.extract_strided_slice %48 {offsets = [0, 1], sizes = [64, 1], strides = [1, 1]} : vector<64x3xf32> to vector<64x1xf32>
      %59 = vector.broadcast %58 : vector<64x1xf32> to vector<64x32xf32>
      %60 = arith.mulf %57, %59 : vector<64x32xf32>
      %61 = arith.truncf %60 : vector<64x32xf32> to vector<64x32xbf16>
      %c1_42 = arith.constant 1 : index
      %c0_43 = arith.constant 0 : index
      %c0_44 = arith.constant 0 : index
      %62 = vector.load %arg12[%c1_42, %c0_43, %c0_44] : memref<3x64x32xbf16, #tpu.memory_space<vmem>>, vector<1x64x32xbf16>
      %63 = vector.shape_cast %62 : vector<1x64x32xbf16> to vector<64x32xbf16>
      %64 = vector.shape_cast %61 : vector<64x32xbf16> to vector<1x64x32xbf16>
      tpu.vector_store %arg12[%c1_42, %c0_43, %c0_44], %64 {strides = array<i32>} : memref<3x64x32xbf16, #tpu.memory_space<vmem>>, vector<1x64x32xbf16>,
      %65 = vector.extract_strided_slice %47 {offsets = [0, 64], sizes = [64, 32], strides = [1, 1]} : vector<64x96xf32> to vector<64x32xf32>
      %66 = vector.extract_strided_slice %48 {offsets = [0, 2], sizes = [64, 1], strides = [1, 1]} : vector<64x3xf32> to vector<64x1xf32>
      %67 = vector.broadcast %66 : vector<64x1xf32> to vector<64x32xf32>
      %68 = arith.mulf %65, %67 : vector<64x32xf32>
      %69 = arith.truncf %68 : vector<64x32xf32> to vector<64x32xbf16>
      %c2_45 = arith.constant 2 : index
      %c0_46 = arith.constant 0 : index
      %c0_47 = arith.constant 0 : index
      %70 = vector.load %arg12[%c2_45, %c0_46, %c0_47] : memref<3x64x32xbf16, #tpu.memory_space<vmem>>, vector<1x64x32xbf16>
      %71 = vector.shape_cast %70 : vector<1x64x32xbf16> to vector<64x32xbf16>
      %72 = vector.shape_cast %69 : vector<64x32xbf16> to vector<1x64x32xbf16>
      tpu.vector_store %arg12[%c2_45, %c0_46, %c0_47], %72 {strides = array<i32>} : memref<3x64x32xbf16, #tpu.memory_space<vmem>>, vector<1x64x32xbf16>,
      %cst_48 = arith.constant 0.000000e+00 : f32
      %73 = vector.broadcast %cst_48 : f32 to vector<2x32xf32>
      %c0_49 = arith.constant 0 : index
      %c0_50 = arith.constant 0 : index
      %74 = vector.load %arg13[%c0_49, %c0_50] : memref<2x32xf32, #tpu.memory_space<vmem>>, vector<2x32xf32>
      tpu.vector_store %arg13[%c0_49, %c0_50], %73 {strides = array<i32>} : memref<2x32xf32, #tpu.memory_space<vmem>>, vector<2x32xf32>,
    } else {
    }
    %c0 = arith.constant 0 : index
    %c0_1 = arith.constant 0 : index
    %3 = vector.load %arg6[%c0, %c0_1] : memref<32x3xf32, #tpu.memory_space<vmem>>, vector<32x3xf32>
    %cst = arith.constant 0.000000e+00 : f32
    %4 = vector.broadcast %cst : f32 to vector<32x32xf32>
    %c0_2 = arith.constant 0 : index
    %c0_3 = arith.constant 0 : index
    %c0_4 = arith.constant 0 : index
    %5 = vector.load %arg1[%c0_2, %c0_3, %c0_4] : memref<3x32x64xbf16, #tpu.memory_space<vmem>>, vector<1x32x64xbf16>
    %6 = vector.shape_cast %5 : vector<1x32x64xbf16> to vector<32x64xbf16>
    %c0_5 = arith.constant 0 : index
    %c0_6 = arith.constant 0 : index
    %c0_7 = arith.constant 0 : index
    %7 = vector.load %arg12[%c0_5, %c0_6, %c0_7] : memref<3x64x32xbf16, #tpu.memory_space<vmem>>, vector<1x64x32xbf16>
    %8 = vector.shape_cast %7 : vector<1x64x32xbf16> to vector<64x32xbf16>
    %cst_8 = arith.constant dense<0.000000e+00> : vector<32x32xf32>
    %9 = tpu.matmul %6, %8, %cst_8 {dimension_numbers = #tpu.dot_dimension_numbers<[1], [0], [0], [1], [0, 0, 1, 1], [], []>} : vector<32x64xbf16>, vector<64x32xbf16>, vector<32x32xf32> -> vector<32x32xf32>
    %10 = vector.extract_strided_slice %3 {offsets = [0, 0], sizes = [32, 1], strides = [1, 1]} : vector<32x3xf32> to vector<32x1xf32>
    %11 = vector.broadcast %10 : vector<32x1xf32> to vector<32x32xf32>
    %12 = arith.mulf %9, %11 : vector<32x32xf32>
    %13 = arith.addf %4, %12 : vector<32x32xf32>
    %c1 = arith.constant 1 : index
    %c0_9 = arith.constant 0 : index
    %c0_10 = arith.constant 0 : index
    %14 = vector.load %arg1[%c1, %c0_9, %c0_10] : memref<3x32x64xbf16, #tpu.memory_space<vmem>>, vector<1x32x64xbf16>
    %15 = vector.shape_cast %14 : vector<1x32x64xbf16> to vector<32x64xbf16>
    %c1_11 = arith.constant 1 : index
    %c0_12 = arith.constant 0 : index
    %c0_13 = arith.constant 0 : index
    %16 = vector.load %arg12[%c1_11, %c0_12, %c0_13] : memref<3x64x32xbf16, #tpu.memory_space<vmem>>, vector<1x64x32xbf16>
    %17 = vector.shape_cast %16 : vector<1x64x32xbf16> to vector<64x32xbf16>
    %cst_14 = arith.constant dense<0.000000e+00> : vector<32x32xf32>
    %18 = tpu.matmul %15, %17, %cst_14 {dimension_numbers = #tpu.dot_dimension_numbers<[1], [0], [0], [1], [0, 0, 1, 1], [], []>} : vector<32x64xbf16>, vector<64x32xbf16>, vector<32x32xf32> -> vector<32x32xf32>
    %19 = vector.extract_strided_slice %3 {offsets = [0, 1], sizes = [32, 1], strides = [1, 1]} : vector<32x3xf32> to vector<32x1xf32>
    %20 = vector.broadcast %19 : vector<32x1xf32> to vector<32x32xf32>
    %21 = arith.mulf %18, %20 : vector<32x32xf32>
    %22 = arith.addf %13, %21 : vector<32x32xf32>
    %c2 = arith.constant 2 : index
    %c0_15 = arith.constant 0 : index
    %c0_16 = arith.constant 0 : index
    %23 = vector.load %arg1[%c2, %c0_15, %c0_16] : memref<3x32x64xbf16, #tpu.memory_space<vmem>>, vector<1x32x64xbf16>
    %24 = vector.shape_cast %23 : vector<1x32x64xbf16> to vector<32x64xbf16>
    %c2_17 = arith.constant 2 : index
    %c0_18 = arith.constant 0 : index
    %c0_19 = arith.constant 0 : index
    %25 = vector.load %arg12[%c2_17, %c0_18, %c0_19] : memref<3x64x32xbf16, #tpu.memory_space<vmem>>, vector<1x64x32xbf16>
    %26 = vector.shape_cast %25 : vector<1x64x32xbf16> to vector<64x32xbf16>
    %cst_20 = arith.constant dense<0.000000e+00> : vector<32x32xf32>
    %27 = tpu.matmul %24, %26, %cst_20 {dimension_numbers = #tpu.dot_dimension_numbers<[1], [0], [0], [1], [0, 0, 1, 1], [], []>} : vector<32x64xbf16>, vector<64x32xbf16>, vector<32x32xf32> -> vector<32x32xf32>
    %28 = vector.extract_strided_slice %3 {offsets = [0, 2], sizes = [32, 1], strides = [1, 1]} : vector<32x3xf32> to vector<32x1xf32>
    %29 = vector.broadcast %28 : vector<32x1xf32> to vector<32x32xf32>
    %30 = arith.mulf %27, %29 : vector<32x32xf32>
    %31 = arith.addf %22, %30 : vector<32x32xf32>
    %c0_21 = arith.constant 0 : index
    %c0_22 = arith.constant 0 : index
    %32 = vector.load %arg4[%c0_21, %c0_22] : memref<1x32xf32, #tpu.memory_space<vmem>>, vector<1x32xf32>
    %33 = vector.broadcast %32 : vector<1x32xf32> to vector<32x32xf32>
    %34 = arith.addf %31, %33 : vector<32x32xf32>
    %cst_23 = arith.constant 0.000000e+00 : f32
    %35 = vector.broadcast %cst_23 : f32 to vector<32x32xf32>
    %36 = arith.maximumf %34, %35 : vector<32x32xf32>
    %c0_24 = arith.constant 0 : index
    %c0_25 = arith.constant 0 : index
    %37 = vector.load %arg13[%c0_24, %c0_25] : memref<2x32xf32, #tpu.memory_space<vmem>>, vector<2x32xf32>
    %c0_26 = arith.constant 0 : index
    %c0_27 = arith.constant 0 : index
    %38 = vector.load %arg7[%c0_26, %c0_27] : memref<32x2xf32, #tpu.memory_space<vmem>>, vector<32x2xf32>
    %cst_28 = arith.constant dense<0.000000e+00> : vector<2x32xf32>
    %39 = tpu.matmul %38, %36, %cst_28 {dimension_numbers = #tpu.dot_dimension_numbers<[0], [0], [1], [1], [0, 1, 1, 1], [], []>} : vector<32x2xf32>, vector<32x32xf32>, vector<2x32xf32> -> vector<2x32xf32>
    %40 = arith.addf %37, %39 : vector<2x32xf32>
    %c0_29 = arith.constant 0 : index
    %c0_30 = arith.constant 0 : index
    %41 = vector.load %arg13[%c0_29, %c0_30] : memref<2x32xf32, #tpu.memory_space<vmem>>, vector<2x32xf32>
    tpu.vector_store %arg13[%c0_29, %c0_30], %40 {strides = array<i32>} : memref<2x32xf32, #tpu.memory_space<vmem>>, vector<2x32xf32>,
    %c1_i32 = arith.constant 1 : i32
    %42 = arith.cmpi eq, %arg0, %c1_i32 : i32
    %43 = arith.extui %42 : i1 to i32
    %c0_i32_31 = arith.constant 0 : i32
    %44 = arith.cmpi ne, %43, %c0_i32_31 : i32
    scf.if %44 {
      %c0_32 = arith.constant 0 : index
      %c0_33 = arith.constant 0 : index
      %45 = vector.load %arg13[%c0_32, %c0_33] : memref<2x32xf32, #tpu.memory_space<vmem>>, vector<2x32xf32>
      %c0_34 = arith.constant 0 : index
      %c0_35 = arith.constant 0 : index
      %46 = vector.load %arg8[%c0_34, %c0_35] : memref<2x1xf32, #tpu.memory_space<vmem>>, vector<2x1xf32>
      %47 = vector.broadcast %46 : vector<2x1xf32> to vector<2x32xf32>
      %48 = arith.mulf %45, %47 : vector<2x32xf32>
      %c0_36 = arith.constant 0 : index
      %c0_37 = arith.constant 0 : index
      %49 = vector.load %arg9[%c0_36, %c0_37] : memref<32x1xf32, #tpu.memory_space<vmem>>, vector<32x1xf32>
      %cst_38 = arith.constant dense<0.000000e+00> : vector<2x1xf32>
      %50 = tpu.matmul %48, %49, %cst_38 {dimension_numbers = #tpu.dot_dimension_numbers<[1], [0], [0], [1], [0, 0, 1, 1], [], []>} : vector<2x32xf32>, vector<32x1xf32>, vector<2x1xf32> -> vector<2x1xf32>
      %c0_39 = arith.constant 0 : index
      %51 = memref.load %arg10[%c0_39] : memref<1xf32, #tpu.memory_space<smem>>
      %52 = vector.broadcast %51 : f32 to vector<2x1xf32>
      %53 = arith.addf %50, %52 : vector<2x1xf32>
      %c0_40 = arith.constant 0 : index
      %c0_41 = arith.constant 0 : index
      %54 = vector.load %arg11[%c0_40, %c0_41] : memref<2x1xf32, #tpu.memory_space<vmem>>, vector<2x1xf32>
      tpu.vector_store %arg11[%c0_40, %c0_41], %53 {strides = array<i32>} : memref<2x1xf32, #tpu.memory_space<vmem>>, vector<2x1xf32>,
    } else {
    }
    return
  }
  func.func @transform_0(%arg0: i32) -> (i32, i32, i32) {
    %c0_i32 = arith.constant 0 : i32
    %c0_i32_0 = arith.constant 0 : i32
    %c0_i32_1 = arith.constant 0 : i32
    return %c0_i32, %arg0, %c0_i32_0 : i32, i32, i32
  }
  func.func @transform_1(%arg0: i32) -> (i32, i32) {
    %c0_i32 = arith.constant 0 : i32
    %c0_i32_0 = arith.constant 0 : i32
    %c0_i32_1 = arith.constant 0 : i32
    return %c0_i32, %c0_i32_0 : i32, i32
  }
  func.func @transform_2(%arg0: i32) -> (i32, i32) {
    %c0_i32 = arith.constant 0 : i32
    %c0_i32_0 = arith.constant 0 : i32
    %c0_i32_1 = arith.constant 0 : i32
    return %c0_i32, %c0_i32_0 : i32, i32
  }
  func.func @transform_3(%arg0: i32) -> (i32, i32) {
    %c0_i32 = arith.constant 0 : i32
    %c0_i32_0 = arith.constant 0 : i32
    %c0_i32_1 = arith.constant 0 : i32
    return %c0_i32, %c0_i32_0 : i32, i32
  }
  func.func @transform_4(%arg0: i32) -> (i32, i32) {
    %c0_i32 = arith.constant 0 : i32
    %c0_i32_0 = arith.constant 0 : i32
    %c0_i32_1 = arith.constant 0 : i32
    return %c0_i32, %c0_i32_0 : i32, i32
  }
  func.func @transform_5(%arg0: i32) -> (i32, i32) {
    %c0_i32 = arith.constant 0 : i32
    %c0_i32_0 = arith.constant 0 : i32
    return %arg0, %c0_i32 : i32, i32
  }
  func.func @transform_6(%arg0: i32) -> (i32, i32) {
    %c0_i32 = arith.constant 0 : i32
    %c0_i32_0 = arith.constant 0 : i32
    return %arg0, %c0_i32 : i32, i32
  }
  func.func @transform_7(%arg0: i32) -> (i32, i32) {
    %c0_i32 = arith.constant 0 : i32
    %c0_i32_0 = arith.constant 0 : i32
    %c0_i32_1 = arith.constant 0 : i32
    return %c0_i32, %c0_i32_0 : i32, i32
  }
  func.func @transform_8(%arg0: i32) -> (i32, i32) {
    %c0_i32 = arith.constant 0 : i32
    %c0_i32_0 = arith.constant 0 : i32
    %c0_i32_1 = arith.constant 0 : i32
    return %c0_i32, %c0_i32_0 : i32, i32
  }
  func.func @transform_9(%arg0: i32) -> i32 {
    %c0_i32 = arith.constant 0 : i32
    %c0_i32_0 = arith.constant 0 : i32
    return %c0_i32 : i32
  }
  func.func @transform_10(%arg0: i32) -> (i32, i32) {
    %c0_i32 = arith.constant 0 : i32
    %c0_i32_0 = arith.constant 0 : i32
    %c0_i32_1 = arith.constant 0 : i32
    return %c0_i32, %c0_i32_0 : i32, i32
  }
}

</mosaic_0001>

<bundles_post_ra>
// kernel: tpu_custom_call.1
= control target key start
LH: loop header
LB: loop body
LE: loop exit
PB: predicated region body
PF: predicated region fallthrough
CT: control target
= control target key end

     0   :  { %s1910_s0 = inlined_call_operand.vmem [shape: bf16[3,64,64], index: 0, kind: input, shape index: {}]   ;;  %s1911_s1 = inlined_call_operand.vmem [shape: f32[64,8], index: 1, kind: input, shape index: {}]   ;;  %s1912_s2 = inlined_call_operand.vmem [shape: f32[8,96], index: 2, kind: input, shape index: {}]   ;;  %s1913_s3 = inlined_call_operand.vmem [shape: f32[1,32], index: 3, kind: input, shape index: {}]   ;;  %s1914_s4 = inlined_call_operand.vmem [shape: f32[64,3], index: 4, kind: input, shape index: {}]   ;;  %s1915_s5 = inlined_call_operand.vmem [shape: f32[64,3], index: 5, kind: input, shape index: {}]   ;;  %s1916_s6 = inlined_call_operand.vmem [shape: f32[64,2], index: 6, kind: input, shape index: {}]   ;;  %s1917_s7 = inlined_call_operand.vmem [shape: f32[2,1], index: 7, kind: input, shape index: {}]   ;;  %s1918_s8 = inlined_call_operand.vmem [shape: f32[32,1], index: 8, kind: input, shape index: {}]   ;;  %s1919_s9 = inlined_call_operand.<no memory space> [shape: f32[1], index: 9, kind: input, shape index: {}]   ;;  %s1920_s10 = inlined_call_operand.vmem [shape: f32[2,1], index: 10, kind: output, shape index: {}]  }
   0x1   :  { %15 = sst [smem:[#allocation4]] %s1919_s9 }
   0x2   :  { %s1732_s15 = smov 0   ;;  %s1734_s16 = smov 0  }
   0x3   :  { %s1736_s17 = smov 0  }
   0x4 LB: > { %s1748_s9 = sadd.s32 4294967295, %s1656_s17   ;;  %s1751_s18 = sadd.s32 1, %s1656_s17   ;;  %s1656_s17 = sphi %s1736_s17, %s1923_s17   ;;  %s1652_s16 = sphi %s1734_s16, %s1922_s16   ;;  %s1648_s15 = sphi %s1732_s15, %s1921_s15  }
   0x5   : > { %s25_s19 = ssub.s32 %s1656_s17, %s1751_s18  ;;  %s28_s20 = sadd.s32 1, %s1652_s16 }
   0x6   : > { %p26_p0 = scmp.eq.s32.totalorder %s25_s19, 0  ;;  %p35_p1 = scmp.ne.s32.totalorder %s1652_s16, %s1648_s15 }
   0x7   : > { %p36_p2 = scmp.eq.s32.totalorder %s1656_s17, 0  ;;  %p1404_p4 = scmp.ge.s32.totalorder %s1656_s17, 2 }
   0x8   : > { %s1760_s21 = scalar_select %p26_p0, %s1652_s16, %s28_s20  }
   0x9   : > { %p37_p3 = por %p36_p2, %p35_p1  ;;  %302 = sbr.rel (%p1404_p4) target bundleno = 23 (0x17), region = 44 }
  0x10   : > { %305 = sbr.rel (!%p37_p3) target bundleno = 23 (0x17), region = 48  ;;  %s307_s22 = sand.u32 (%p37_p3), 1, %s1652_s16  }
  0x11   : > { %s1447_s23 = sshll.u32 (%p37_p3), %s1656_s17, 4  ;;  %s1571_s24 = smul.u32 (%p37_p3), 48, %s307_s22 }
  0x12   : > { %s312_s27 = scalar_lea.vmem (%p37_p3), %s1910_s0, %s1447_s23 }
  0x13   : > { %v328_v0 = vld [vmem:[%s312_s27] sm:$0xff] (%p37_p3)   ;;  %v332_v1 = vld [vmem:[%s312_s27 + $0x8] sm:$0xff] (%p37_p3)   ;;  %s309_s28 = scalar_lea.vmem (%p37_p3), [#allocation5], %s1571_s24 }
  0x14   : > { %v336_v2 = vld [vmem:[%s312_s27 + $0x20] sm:$0xff] (%p37_p3)   ;;  %v340_v3 = vld [vmem:[%s312_s27 + $0x28] sm:$0xff] (%p37_p3)   ;;  %329 = vst [vmem:[%s309_s28] sm:$0xff] (%p37_p3), %v328_v0   ;;  %333 = vst [vmem:[%s309_s28 + $0x8] sm:$0xff] (%p37_p3), %v332_v1  }
  0x15   : > { %v344_v4 = vld [vmem:[%s312_s27 + $0x40] sm:$0xff] (%p37_p3)   ;;  %v348_v5 = vld [vmem:[%s312_s27 + $0x48] sm:$0xff] (%p37_p3)   ;;  %337 = vst [vmem:[%s309_s28 + $0x10] sm:$0xff] (%p37_p3), %v336_v2   ;;  %341 = vst [vmem:[%s309_s28 + $0x18] sm:$0xff] (%p37_p3), %v340_v3  }
  0x16   : > { %345 = vst [vmem:[%s309_s28 + $0x20] sm:$0xff] (%p37_p3), %v344_v4   ;;  %349 = vst [vmem:[%s309_s28 + $0x28] sm:$0xff] (%p37_p3), %v348_v5  }
  0x17 PF: > { %p1407_p5 = scmp.ge.s32.totalorder %s1656_s17, 1  ;;  %p415_p6 = scmp.lt.s32.totalorder %s1656_s17, 3 }
  0x19   : > { %p416_p7 = pnand %p1407_p5, %p415_p6 }
  0x1a   : > { %s422_s29 = sand.u32 (!%p416_p7), 1, %s1648_s15   ;;  %s1408_s30 = sshll.u32 (!%p416_p7), %s1748_s9, 2 }
  0x1b   : > { %419 = sbr.rel (%p416_p7) target bundleno = 1092 (0x444), region = 97  ;;  %p466_p8 = scmp.lt.s32.totalorder (!%p416_p7), %s1408_s30, 7 }
  0x1c   : > { %s1572_s11 = smul.u32 (!%p416_p7), 48, %s422_s29  ;;  %p1412_p9 = scmp.ne.s32.totalorder (!%p416_p7), %s1748_s9, 0 }
  0x1e   : > { %s1782_s17 = scalar_lea.vmem (!%p416_p7), [#allocation5], %s1572_s11 }
  0x22   : > { %s1925_s30 = smov (!%p466_p8, %s1408_s30), 7  ;;  %481 = sbr.rel (%p1412_p9) target bundleno = 388 (0x184), region = 105 }
  0x23   : > { %s1409_s12 = sshll.u32 %s1925_s30, 3  ;;  %v490_v6 = vld [vmem:[%s1912_s2] sm:$0xff] (!%p1412_p9)  ;;  %vm491_vm0 = vcmask (!%p1412_p9), 64512   ;;  %v483_v9 = vld [vmem:[%s1911_s1 + $0x8] sm:$0xff] (!%p1412_p9)  ;;  %v484_v11 = vld [vmem:[%s1911_s1 + $0x10] sm:$0xff] (!%p1412_p9)  ;;  %v1658_v17 = vmov (!%p1412_p9), 1  }
  0x24   : > { %s1775_s19 = scalar_lea.vmem %s1915_s5, %s1409_s12  ;;  %s1780_s23 = scalar_lea.vmem %s1916_s6, %s1409_s12  ;;  %v482_v7 = vld [vmem:[%s1911_s1] sm:$0xff] (!%p1412_p9)  ;;  %1485 = vmatprep.subr.mxu0 (!%p1412_p9), %v490_v6  ;;  %1569 = vmatprep.subr.mxu1 (!%p1412_p9), %v490_v6  ;;  %v487_v10 = vld [vmem:[%s1911_s1 + $0x28] sm:$0xff] (!%p1412_p9)  ;;  %v488_v12 = vld [vmem:[%s1911_s1 + $0x30] sm:$0xff] (!%p1412_p9)  ;;  %v1659_v24 = vmov (!%p1412_p9), 2   ;;  %v1660_v25 = vmov (!%p1412_p9), 0   ;;  %vm681_vm1 = vcmask (!%p1412_p9), 261120  }
  0x25   : > { %v486_v8 = vld [vmem:[%s1911_s1 + $0x20] sm:$0xff] (!%p1412_p9)  ;;  %1486 = vmatpush3.msra.mxu0 (!%p1412_p9), %v490_v6  ;;  %1570 = vmatpush3.msra.mxu1 (!%p1412_p9), %v490_v6  ;;  %v623_v13 = vld [vmem:[%s1914_s4 + $0x10] sm:$0xff] (!%p1412_p9)  ;;  %v485_v15 = vld [vmem:[%s1911_s1 + $0x18] sm:$0xff] (!%p1412_p9)  ;;  %s1661_s29 = smov (!%p1412_p9), 96   ;;  %vm816_vm2 = vcmask (!%p1412_p9), 254976   ;;  %s1663_s30 = smov (!%p1412_p9), 64  }
  0x26   : > { %1487 = vmatprep.mubr.msk.f32.mxu0 (!%p1412_p9), %vm491_vm0, %v482_v7  ;;  %1493 = vmatprep.mubr.msk.f32.mxu1 (!%p1412_p9), %vm491_vm0, %v486_v8  ;;  %v621_v14 = vld [vmem:[%s1914_s4] sm:$0xff] (!%p1412_p9)  ;;  %v489_v16 = vld [vmem:[%s1911_s1 + $0x38] sm:$0xff] (!%p1412_p9)  ;;  %v622_v19 = vld [vmem:[%s1914_s4 + $0x8] sm:$0xff] (!%p1412_p9) }
  0x27   : > { %1488 = vmatmul.mubr.msk.f32.vlgmr.msra.gmra.mrb[0].mxu0 (!%p1412_p9), %vm491_vm0, %v483_v9  ;;  %1494 = vmatmul.mubr.msk.f32.vlgmr.msra.gmra.mrb[0].mxu1 (!%p1412_p9), %vm491_vm0, %v487_v10  ;;  %v624_v18 = vld [vmem:[%s1914_s4 + $0x18] sm:$0xff] (!%p1412_p9)  ;;  %v626_v20 = vld [vmem:[%s1914_s4 + $0x28] sm:$0xff] (!%p1412_p9)  ;;  %v625_v21 = vld [vmem:[%s1914_s4 + $0x20] sm:$0xff] (!%p1412_p9) }
  0x28   : > { %1490 = vmatprep.mubr.msk.f32.mxu0 (!%p1412_p9), %vm491_vm0, %v484_v11  ;;  %1496 = vmatprep.mubr.msk.f32.mxu1 (!%p1412_p9), %vm491_vm0, %v488_v12  ;;  %v628_v22 = vld [vmem:[%s1914_s4 + $0x38] sm:$0xff] (!%p1412_p9)  ;;  %v627_v23 = vld [vmem:[%s1914_s4 + $0x30] sm:$0xff] (!%p1412_p9) }
  0x29   : > { %1614 = vset.pattern.permute.xlu1 %v1658_v17  ;;  %1613 = vset.pattern.permute.xlu0 %v1658_v17 }
  0x2a   : > { %695 = vperm.xlu1 %1614, %v623_v13   ;;  %687 = vperm.xlu0 %1613, %v621_v14  }
  0x2b   : > { %1491 = vmatmul.mubr.msk.f32.gmra.mrb[2].mxu0 %vm491_vm0, %v485_v15  ;;  %1497 = vmatmul.mubr.msk.f32.gmra.mrb[2].mxu1 %vm491_vm0, %v489_v16 }
  0x2e   : > { %699 = vperm.xlu1 %1614, %v624_v18   ;;  %691 = vperm.xlu0 %1613, %v622_v19  }
  0x32   : > { %707 = vperm.xlu1 %1614, %v626_v20   ;;  %703 = vperm.xlu0 %1613, %v625_v21  }
  0x36   : > { %715 = vperm.xlu1 %1614, %v628_v22   ;;  %711 = vperm.xlu0 %1613, %v627_v23  }
  0x3a   : > { %1616 = vset.pattern.permute.xlu1 %v1659_v24  ;;  %1615 = vset.pattern.permute.xlu0 %v1659_v24 }
  0x3b   : > { %756 = vperm.xlu1 %1616, %v622_v19   ;;  %752 = vperm.xlu0 %1615, %v621_v14  }
  0x3f   : > { %760 = vperm.xlu1 %1616, %v623_v13   ;;  %764 = vperm.xlu0 %1615, %v624_v18  }
  0x43   : > { %768 = vperm.xlu1 %1616, %v625_v21   ;;  %772 = vperm.xlu0 %1615, %v626_v20  }
  0x47   : > { %776 = vperm.xlu1 %1616, %v627_v23   ;;  %780 = vperm.xlu0 %1615, %v628_v22  }
  0x4b   : > { %1617 = vset.pattern.permute.xlu1 %v1660_v25  ;;  %1618 = vset.pattern.permute.xlu0 %v1660_v25 }
  0x4c   : > { %631 = vperm.xlu1 %1617, %v621_v14   ;;  %636 = vperm.xlu0 %1618, %v622_v19  }
  0x50   : > { %641 = vperm.xlu1 %1617, %v623_v13   ;;  %651 = vperm.xlu0 %1618, %v625_v21  }
  0x54   : > { %646 = vperm.xlu1 %1617, %v624_v18   ;;  %661 = vperm.xlu0 %1618, %v627_v23  }
  0x58   : > { %656 = vperm.xlu1 %1617, %v626_v20   ;;  %1619 = vset.pattern.permute.xlu0 %v1659_v24 }
  0x5c   : > { %666 = vperm.xlu1 %1617, %v628_v22  }
  0xa9   : > { %v696_v26 = vpop.permute.xlu1 %695  ;;  %v688_v29 = vpop.permute.xlu0 %687 }
  0xad   : > { %v700_v27 = vpop.permute.xlu1 %699  ;;  %v692_v31 = vpop.permute.xlu0 %691 }
  0xb1   : > { %v708_v28 = vpop.permute.xlu1 %707  ;;  %v704_v33 = vpop.permute.xlu0 %703 }
  0xb5   : > { %v716_v30 = vpop.permute.xlu1 %715  ;;  %v712_v35 = vpop.permute.xlu0 %711 }
  0xba   : > { %v757_v32 = vpop.permute.xlu1 %756  ;;  %v753_v37 = vpop.permute.xlu0 %752 }
  0xbe   : > { %v761_v34 = vpop.permute.xlu1 %760  ;;  %v765_v39 = vpop.permute.xlu0 %764 }
  0xc2   : > { %v769_v36 = vpop.permute.xlu1 %768  ;;  %v773_v41 = vpop.permute.xlu0 %772 }
  0xc6   : > { %v777_v38 = vpop.permute.xlu1 %776  ;;  %v781_v43 = vpop.permute.xlu0 %780 }
  0xcb   : > { %v632_v40 = vpop.permute.xlu1 %631  ;;  %v637_v45 = vpop.permute.xlu0 %636 }
  0xcf   : > { %v642_v42 = vpop.permute.xlu1 %641  ;;  %v652_v47 = vpop.permute.xlu0 %651 }
  0xd3   : > { %v647_v44 = vpop.permute.xlu1 %646  ;;  %v662_v0 = vpop.permute.xlu0 %661 }
  0xd7   : > { %v657_v46 = vpop.permute.xlu1 %656 }
  0xdb   : > { %v667_v63 = vpop.permute.xlu1 %666 }
  0xfa   : > { %v1489_v48 = vpop.f32.mrb[0].mxu0  ;;  %v1495_v49 = vpop.f32.mrb[0].mxu1 }
  0xfb   : > { %v670_v50 = vmul.f32 %v1489_v48, %v637_v45  ;;  %v719_v51 = vmul.f32 %v1489_v48, %v692_v31  ;;  %v784_v52 = vmul.f32 %v1489_v48, %v757_v32  ;;  %v582_v53 = vpop.f32.mrb[1].mxu0  ;;  %v602_v54 = vpop.f32.mrb[1].mxu1  ;;  %v723_v55 = vmul.f32 %v1495_v49, %v708_v28 }
  0xfc   : > { %v669_v56 = vmul.f32 %v632_v40, %v582_v53  ;;  %v718_v57 = vmul.f32 %v688_v29, %v582_v53  ;;  %v783_v58 = vmul.f32 %v753_v37, %v582_v53  ;;  %v788_v59 = vmul.f32 %v1495_v49, %v773_v41 }
  0xfd   : > { %v722_v60 = vmul.f32 %v704_v33, %v602_v54  ;;  %v674_v61 = vmul.f32 %v1495_v49, %v657_v46  ;;  %v673_v62 = vmul.f32 %v652_v47, %v602_v54  ;;  %v787_v2 = vmul.f32 %v769_v36, %v602_v54 }
  0xfe   : > { %v677_v1 = vpack.c.bf16 %v670_v50, %v669_v56  ;;  %v1492_v3 = vpop.f32.mrb[2].mxu0  ;;  %v1498_v4 = vpop.f32.mrb[2].mxu1  ;;  %v726_v5 = vpack.c.bf16 %v719_v51, %v718_v57  ;;  %v791_v6 = vpack.c.bf16 %v784_v52, %v783_v58 }
  0xff   : > { %v679_v7 = vpack.c.bf16 %v674_v61, %v673_v62  ;;  %v672_v8 = vmul.f32 %v1492_v3, %v647_v44  ;;  %v721_v9 = vmul.f32 %v1492_v3, %v700_v27  ;;  %v786_v10 = vmul.f32 %v1492_v3, %v765_v39  ;;  %v592_v11 = vpop.f32.mrb[3].mxu0  ;;  %v612_v12 = vpop.f32.mrb[3].mxu1 }
 0x100   : > { %682 = vst.msk [vmem:[#allocation2] sm:$0xff] %vm681_vm1, %v677_v1  ;;  %v725_v13 = vmul.f32 %v1498_v4, %v716_v30  ;;  %v790_v14 = vmul.f32 %v1498_v4, %v781_v43  ;;  %v671_v15 = vmul.f32 %v642_v42, %v592_v11  ;;  %v720_v16 = vmul.f32 %v696_v26, %v592_v11 }
 0x101   : > { %734 = vrot.lane.b32.xlu0 %v726_v5, %s1661_s29  ;;  %684 = vst.msk [vmem:[#allocation2 + $0x10] sm:$0xff] %vm681_vm1, %v679_v7  ;;  %v785_v17 = vmul.f32 %v761_v34, %v592_v11  ;;  %v724_v18 = vmul.f32 %v712_v35, %v612_v12  ;;  %v789_v19 = vmul.f32 %v777_v38, %v612_v12  ;;  %v1662_v26 = vmov 0.0  }
 0x102   : > { %v676_v20 = vmul.f32 %v1498_v4, %v667_v63  ;;  %v678_v21 = vpack.c.bf16 %v672_v8, %v671_v15  ;;  %v727_v22 = vpack.c.bf16 %v721_v9, %v720_v16  ;;  %v675_v23 = vmul.f32 %v662_v0, %v612_v12  ;;  %817 = vst.msk [vmem:[#allocation3] sm:$0x3] %vm816_vm2, %v1662_v26 }
 0x103   : > { %v728_v24 = vpack.c.bf16 %v723_v55, %v722_v60  ;;  %v792_v25 = vpack.c.bf16 %v786_v10, %v785_v17  ;;  %v729_v27 = vpack.c.bf16 %v725_v13, %v724_v18  ;;  %v794_v28 = vpack.c.bf16 %v790_v14, %v789_v19 }
 0x104   : > { %v793_v29 = vpack.c.bf16 %v788_v59, %v787_v2  ;;  %683 = vst.msk [vmem:[#allocation2 + $0x8] sm:$0xff] %vm681_vm1, %v678_v21  ;;  %v680_v30 = vpack.c.bf16 %v676_v20, %v675_v23  ;;  %736 = vrot.lane.b32.xlu1 %v727_v22, %s1661_s29 }
 0x105   : > { %738 = vrot.lane.b32.xlu0 %v728_v24, %s1661_s29 }
 0x106   : > { %685 = vst.msk [vmem:[#allocation2 + $0x18] sm:$0xff] %vm681_vm1, %v680_v30 }
 0x108   : > { %740 = vrot.lane.b32.xlu1 %v729_v27, %s1661_s29 }
 0x109   : > { %799 = vrot.lane.b32.xlu0 %v791_v6, %s1663_s30 }
 0x10c   : > { %801 = vrot.lane.b32.xlu1 %v792_v25, %s1663_s30 }
 0x10d   : > { %803 = vrot.lane.b32.xlu0 %v793_v29, %s1663_s30 }
 0x110   : > { %805 = vrot.lane.b32.xlu1 %v794_v28, %s1663_s30 }
 0x173   : > { %v735_v31 = vpop.permute.xlu0 %734 }
 0x174   : > { %747 = vst.msk [vmem:[#allocation2 + $0x20] sm:$0xff] %vm681_vm1, %v735_v31 }
 0x176   : > { %v737_v33 = vpop.permute.xlu1 %736 }
 0x177   : > { %v739_v32 = vpop.permute.xlu0 %738  ;;  %748 = vst.msk [vmem:[#allocation2 + $0x28] sm:$0xff] %vm681_vm1, %v737_v33 }
 0x178   : > { %749 = vst.msk [vmem:[#allocation2 + $0x30] sm:$0xff] %vm681_vm1, %v739_v32 }
 0x17a   : > { %v741_v35 = vpop.permute.xlu1 %740 }
 0x17b   : > { %v800_v34 = vpop.permute.xlu0 %799  ;;  %750 = vst.msk [vmem:[#allocation2 + $0x38] sm:$0xff] %vm681_vm1, %v741_v35 }
 0x17c   : > { %812 = vst.msk [vmem:[#allocation2 + $0x40] sm:$0xff] %vm681_vm1, %v800_v34 }
 0x17e   : > { %v802_v37 = vpop.permute.xlu1 %801 }
 0x17f   : > { %v804_v36 = vpop.permute.xlu0 %803  ;;  %813 = vst.msk [vmem:[#allocation2 + $0x48] sm:$0xff] %vm681_vm1, %v802_v37 }
 0x180   : > { %814 = vst.msk [vmem:[#allocation2 + $0x50] sm:$0xff] %vm681_vm1, %v804_v36 }
 0x182   : > { %v806_v38 = vpop.permute.xlu1 %805 }
 0x183   : > { %815 = vst.msk [vmem:[#allocation2 + $0x58] sm:$0xff] %vm681_vm1, %v806_v38 }
 0x184 PF: > { %v826_v39 = vld [vmem:[#allocation2] sm:$0xff]  ;;  %v827_v41 = vld [vmem:[#allocation2 + $0x8] sm:$0xff]  ;;  %v828_v43 = vld [vmem:[#allocation2 + $0x10] sm:$0xff]  ;;  %vm840_vm3 = vcmask 523264   ;;  %v1664_v47 = vmov 1   ;;  %v1665_v48 = vmov 0  }
 0x185   : > { %v930_v40 = vld [vmem:[#allocation2 + $0x20] sm:$0xff]  ;;  %1499 = vmatprep.subr.bf16.mxu0 %v826_v39  ;;  %v931_v42 = vld [vmem:[#allocation2 + $0x28] sm:$0xff]  ;;  %v932_v44 = vld [vmem:[#allocation2 + $0x30] sm:$0xff]  ;;  %1621 = vset.pattern.permute.xlu1 %v1664_v47  ;;  %v1666_v60 = vmov 2   ;;  %v1667_v4 = vmov 0.0|0.0   ;;  %vm1668_vm4 = vmmov 0  }
 0x186   : > { %1511 = vmatprep.subr.bf16.mxu1 %v930_v40  ;;  %1500 = vmatpush3.bf16.msra.mxu0 %v826_v39  ;;  %v1627_v45 = vld [vmem:[%s1782_s17] sm:$0xff]   ;;  %v1628_v46 = vld [vmem:[%s1782_s17 + $0x10] sm:$0xff]   ;;  %v1629_v53 = vld [vmem:[%s1782_s17 + $0x8] sm:$0xff]   ;;  %v1669_v5 = vmov 0.0   ;;  %vm1174_vm5 = vcmask 261120   ;;  %vm1249_vm6 = vcmask 254976  }
 0x187   : > { %1512 = vmatpush3.bf16.msra.mxu1 %v930_v40  ;;  %1501 = vmatprep.subr.bf16.mxu0 %v827_v41  ;;  %v829_v49 = vld [vmem:[#allocation2 + $0x18] sm:$0xff]  ;;  %v818_v51 = vld [vmem:[%s1775_s19] sm:$0xff]  ;;  %v819_v55 = vld [vmem:[%s1775_s19 + $0x8] sm:$0xff]  ;;  %p1443_p10 = scmp.ne.s32.totalorder %s1748_s9, 1 }
 0x188   : > { %1513 = vmatprep.subr.bf16.mxu1 %v931_v42  ;;  %1620 = vset.pattern.permute.xlu0 %v1665_v48  ;;  %v933_v50 = vld [vmem:[#allocation2 + $0x38] sm:$0xff]  ;;  %v1029_v52 = vld [vmem:[#allocation2 + $0x40] sm:$0xff]  ;;  %v1030_v57 = vld [vmem:[#allocation2 + $0x48] sm:$0xff]  ;;  %vm1672_vm7 = vmmov (!%p1443_p10), 0   ;;  %s1267_s25 = sld [smem:[#allocation4]] (!%p1443_p10)  ;;  %vm1342_vm8 = vcmask (!%p1443_p10), 1024  }
 0x189   : > { %1507 = vmatprep.mubr.msk.bf16.mxu0 %vm840_vm3, %v1627_v45  ;;  %1519 = vmatprep.mubr.msk.bf16.mxu1 %vm840_vm3, %v1628_v46  ;;  %v1630_v54 = vld [vmem:[%s1782_s17 + $0x18] sm:$0xff]   ;;  %v1631_v56 = vld [vmem:[%s1782_s17 + $0x20] sm:$0xff]   ;;  %v1632_v63 = vld [vmem:[%s1782_s17 + $0x28] sm:$0xff]  }
 0x18a   : > { %1502 = vmatpush3.bf16.msra.mxu0 %v827_v41  ;;  %1000 = vperm.xlu1 %1621, %v818_v51   ;;  %v821_v58 = vld [vmem:[%s1775_s19 + $0x18] sm:$0xff]  ;;  %v1031_v59 = vld [vmem:[#allocation2 + $0x50] sm:$0xff]  ;;  %v1138_v0 = vld [vmem:[%s1780_s23] sm:$0xff] }
 0x18b   : > { %1514 = vmatpush3.bf16.msra.mxu1 %v931_v42  ;;  %1503 = vmatprep.subr.bf16.mxu0 %v828_v43  ;;  %v820_v61 = vld [vmem:[%s1775_s19 + $0x10] sm:$0xff]  ;;  %v1032_v62 = vld [vmem:[#allocation2 + $0x58] sm:$0xff]  ;;  %v1139_v1 = vld [vmem:[%s1780_s23 + $0x8] sm:$0xff] }
 0x18c   : > { %1515 = vmatprep.subr.bf16.mxu1 %v932_v44  ;;  %898 = vperm.xlu0 %1620, %v818_v51   ;;  %v1140_v2 = vld [vmem:[%s1780_s23 + $0x10] sm:$0xff]  ;;  %v1141_v3 = vld [vmem:[%s1780_s23 + $0x18] sm:$0xff]  ;;  %v1441_v41 = vld [vmem:[%s1913_s3] ss:$0 sm:$0xff] }
 0x18e   : > { %1504 = vmatpush3.bf16.msra.mxu0 %v828_v43  ;;  %1004 = vperm.xlu1 %1621, %v819_v55  }
 0x18f   : > { %1516 = vmatpush3.bf16.msra.mxu1 %v932_v44  ;;  %1505 = vmatprep.subr.bf16.mxu0 %v829_v49 }
 0x190   : > { %1517 = vmatprep.subr.bf16.mxu1 %v933_v50  ;;  %903 = vperm.xlu0 %1620, %v819_v55  }
 0x192   : > { %1506 = vmatpush3.bf16.msra.mxu0 %v829_v49  ;;  %1622 = vset.pattern.permute.xlu1 %v1666_v60 }
 0x193   : > { %1518 = vmatpush3.bf16.msra.mxu1 %v933_v50  ;;  %1523 = vmatprep.subr.bf16.mxu0 %v1029_v52 }
 0x194   : > { %913 = vperm.xlu0 %1620, %v821_v58   ;;  %1103 = vperm.xlu1 %1622, %v819_v55  }
 0x195   : > { %1508 = vmatmul.mubr.msk.bf16.vlgmr.msra.gmra.mrb[0].mxu0 %vm840_vm3, %v1629_v53  ;;  %1557 = vmatprep.subr.bf16.mxu1 %v1667_v4 }
 0x196   : > { %1520 = vmatmul.mubr.msk.bf16.vlgmr.msra.gmra.mrb[0].mxu1 %vm840_vm3, %v1630_v54  ;;  %1524 = vmatpush3.bf16.msra.mxu0 %v1029_v52 }
 0x197   : > { %1531 = vmatprep.mubr.msk.bf16.mxu0 %vm840_vm3, %v1631_v56  ;;  %1525 = vmatprep.subr.bf16.mxu0 %v1030_v57 }
 0x198   : > { %1624 = vset.pattern.permute.xlu0 %v1666_v60  ;;  %1623 = vset.pattern.permute.xlu1 %v1665_v48 }
 0x199   : > { %1099 = vperm.xlu0 %1624, %v818_v51   ;;  %908 = vperm.xlu1 %1623, %v820_v61  }
 0x19a   : > { %1526 = vmatpush3.bf16.msra.mxu0 %v1030_v57  ;;  %1543 = vmatprep.mubr.msk.f32.mxu1 %vm1668_vm4, %v1669_v5  ;;  %v1670_v5 = vmov (!%p1443_p10), 0  }
 0x19b   : > { %1527 = vmatprep.subr.bf16.mxu0 %v1031_v59 }
 0x19d   : > { %1107 = vperm.xlu0 %1624, %v820_v61   ;;  %1625 = vset.pattern.permute.xlu1 %v1664_v47 }
 0x19e   : > { %1528 = vmatpush3.bf16.msra.mxu0 %v1031_v59  ;;  %1008 = vperm.xlu1 %1625, %v820_v61  }
 0x19f   : > { %1529 = vmatprep.subr.bf16.mxu0 %v1032_v62 }
 0x1a1   : > { %1633 = vset.pattern.permute.xlu0 (!%p1443_p10), %v1670_v5 }
 0x1a2   : > { %1530 = vmatpush3.bf16.msra.mxu0 %v1032_v62  ;;  %1012 = vperm.xlu1 %1625, %v821_v58   ;;  %v1137_v62 = vld [vmem:[#allocation3] sm:$0x3] }
 0x1a5   : > { %1532 = vmatmul.mubr.msk.bf16.vlgmr.msra.gmra.mrb[4].mxu0 %vm840_vm3, %v1632_v63 }
 0x1a6   : > { %1626 = vset.pattern.permute.xlu1 %v1666_v60 }
 0x1a7   : > { %1111 = vperm.xlu1 %1626, %v821_v58  }
 0x1d0   : > { %1142 = vxpose.xlu1.b32.start [1/4] (short) (narrow) %v1138_v0, 8 }
 0x1d4   : > { %1143 = vxpose.xlu1.b32.cont [2/4] (short) (narrow) %v1139_v1, 8 }
 0x1d8   : > { %1144 = vxpose.xlu1.b32.cont [3/4] (short) (narrow) %v1140_v2, 8  ;;  %v1256_v2 = vld [vmem:[%s1917_s7] sm:$0x3] (!%p1443_p10) }
 0x1d9   : > { %1259 = vperm.xlu0 (!%p1443_p10), %1633, %v1256_v2  }
 0x1dc   : > { %1145 = vxpose.xlu1.b32.end [4/4] (short) (narrow) %v1141_v3, 8  ;;  %v1263_v3 = vld [vmem:[%s1918_s8] sm:$0xff] (!%p1443_p10) }
 0x209   : > { %v1001_v6 = vpop.permute.xlu1 %1000 }
 0x20b   : > { %v899_v10 = vpop.permute.xlu0 %898 }
 0x20d   : > { %v1005_v7 = vpop.permute.xlu1 %1004 }
 0x20f   : > { %v904_v12 = vpop.permute.xlu0 %903 }
 0x213   : > { %v1104_v8 = vpop.permute.xlu1 %1103  ;;  %v914_v14 = vpop.permute.xlu0 %913 }
 0x218   : > { %v909_v9 = vpop.permute.xlu1 %908  ;;  %v1100_v35 = vpop.permute.xlu0 %1099 }
 0x21c   : > { %v1108_v36 = vpop.permute.xlu0 %1107 }
 0x21d   : > { %v1009_v11 = vpop.permute.xlu1 %1008 }
 0x221   : > { %v1013_v13 = vpop.permute.xlu1 %1012 }
 0x226   : > { %v1112_v40 = vpop.permute.xlu1 %1111 }
 0x250   : > { %v1158_v61 = vpop.trf.xlu1 }
 0x268   : > { %v1509_v15 = vpop.f32.mrb[0].mxu0 }
 0x269   : > { %v1521_v16 = vpop.f32.mrb[0].mxu1  ;;  %v918_v17 = vmul.f32 %v1509_v15, %v909_v9  ;;  %v881_v19 = vpop.f32.mrb[1].mxu0  ;;  %v1266_v9 = vld [vmem:[%s1918_s8 + $0x18] sm:$0xff] (!%p1443_p10)  ;;  %v1268_v15 = vstv (!%p1443_p10), %s1267_s25 }
 0x26a   : > { %v1017_v18 = vmul.f32 %v1521_v16, %v1009_v11  ;;  %v984_v20 = vpop.f32.mrb[1].mxu1  ;;  %v916_v21 = vmul.f32 %v899_v10, %v881_v19  ;;  %v1510_v23 = vpop.f32.mrb[2].mxu0  ;;  %v1673_v11 = vmov (!%p1443_p10), 0.0  }
 0x26b   : > { %v1015_v22 = vmul.f32 %v1001_v6, %v984_v20  ;;  %v1522_v24 = vpop.f32.mrb[2].mxu1  ;;  %v919_v28 = vmul.f32 %v1510_v23, %v914_v14  ;;  %v884_v29 = vpop.f32.mrb[3].mxu0  ;;  %v1671_v6 = vmov (!%p1443_p10), 0.0|0.0   ;;  %1554 = vmatprep.mubr.msk.f32.mxu0 (!%p1443_p10), %vm1672_vm7, %v1673_v11 }
 0x26c   : > { %v1021_v25 = vadd.f32 %v1017_v18, %v918_v17  ;;  %v1018_v27 = vmul.f32 %v1522_v24, %v1013_v13  ;;  %v987_v30 = vpop.f32.mrb[3].mxu1  ;;  %v917_v31 = vmul.f32 %v904_v12, %v884_v29  ;;  %1563 = vmatprep.subr.bf16.mxu0 (!%p1443_p10), %v1671_v6  ;;  %v1260_v13 = vpop.permute.xlu0 (!%p1443_p10), %1259 }
 0x26d   : > { %v1019_v26 = vadd.f32 %v1015_v22, %v916_v21  ;;  %v1016_v32 = vmul.f32 %v1005_v7, %v987_v30 }
 0x26e   : > { %v1022_v33 = vadd.f32 %v1018_v27, %v919_v28 }
 0x26f   : > { %v1020_v34 = vadd.f32 %v1016_v32, %v917_v31 }
 0x278   : > { %v1533_v37 = vpop.f32.mrb[4].mxu0 }
 0x279   : > { %v1116_v38 = vmul.f32 %v1533_v37, %v1108_v36  ;;  %v1083_v39 = vpop.f32.mrb[5].mxu0 }
 0x27a   : > { %v1114_v42 = vmul.f32 %v1100_v35, %v1083_v39  ;;  %v1534_v43 = vpop.f32.mrb[6].mxu0 }
 0x27b   : > { %v1120_v44 = vadd.f32 %v1116_v38, %v1021_v25  ;;  %v1117_v45 = vmul.f32 %v1534_v43, %v1112_v40  ;;  %v1086_v46 = vpop.f32.mrb[7].mxu0 }
 0x27c   : > { %v1118_v47 = vadd.f32 %v1114_v42, %v1019_v26  ;;  %v1115_v48 = vmul.f32 %v1104_v8, %v1086_v46  ;;  %v1265_v8 = vld [vmem:[%s1918_s8 + $0x10] sm:$0xff] (!%p1443_p10) }
 0x27d   : > { %v1131_v49 = vadd.f32 %v1441_v41, %v1120_v44  ;;  %v1121_v50 = vadd.f32 %v1117_v45, %v1022_v33  ;;  %v1567_v10 = vpack.c.bf16 (!%p1443_p10), %v1266_v9, %v1265_v8 }
 0x27e   : > { %v1129_v51 = vadd.f32 %v1441_v41, %v1118_v47  ;;  %v1119_v52 = vadd.f32 %v1115_v48, %v1020_v34 }
 0x27f   : > { %v1132_v53 = vadd.f32 %v1441_v41, %v1121_v50  ;;  %v1135_v55 = vmax.f32 %v1131_v49, 0.0 }
 0x280   : > { %v1130_v54 = vadd.f32 %v1441_v41, %v1119_v52  ;;  %v1133_v57 = vmax.f32 %v1129_v51, 0.0 }
 0x281   : > { %v1136_v56 = vmax.f32 %v1132_v53, 0.0 }
 0x282   : > { %v1134_v58 = vmax.f32 %v1130_v54, 0.0 }
 0x283   : > { %v1561_v59 = vpack.c.bf16 %v1136_v56, %v1135_v55 }
 0x284   : > { %v1558_v60 = vpack.c.bf16 %v1134_v58, %v1133_v57 }
 0x286   : > { %1559 = vmatpush3.bf16.msra.mxu1 %v1558_v60 }
 0x287   : > { %1560 = vmatprep.subr.bf16.mxu1 %v1667_v4  ;;  %v1264_v4 = vld [vmem:[%s1918_s8 + $0x8] sm:$0xff] (!%p1443_p10) }
 0x288   : > { %v1564_v7 = vpack.c.bf16 (!%p1443_p10), %v1264_v4, %v1263_v3 }
 0x28a   : > { %1562 = vmatpush3.bf16.msra.mxu1 %v1561_v59  ;;  %1565 = vmatpush3.bf16.msra.mxu0 (!%p1443_p10), %v1564_v7 }
 0x28b   : > { %1566 = vmatprep.subr.bf16.mxu0 (!%p1443_p10), %v1671_v6 }
 0x28d   : > { %1544 = vmatmul.mubr.msk.f32.vlgmr.msra.gmra.mrb[4].mxu1 %vm1174_vm5, %v1158_v61 }
 0x28e   : > { %1568 = vmatpush3.bf16.msra.mxu0 (!%p1443_p10), %v1567_v10 }
 0x35d   : > { %1254 = sbr.rel (%p1443_p10) target bundleno = 1092 (0x444), region = 109 }
 0x360   : > { %v1244_v63 = vpop.f32.mrb[4].mxu1 }
 0x361   : > { %v1248_v0 = vadd.f32 %v1244_v63, %v1137_v62  ;;  %v1545_v1 = vpop.f32.mrb[5].mxu1 }
 0x363   : > { %1250 = vst.msk [vmem:[#allocation3] sm:$0x3] %vm1249_vm6, %v1248_v0 }
 0x36a   : > { %v1255_v12 = vld [vmem:[#allocation3] sm:$0x3] }
 0x36b   : > { %v1262_v14 = vmul.f32 %v1260_v13, %v1255_v12 }
 0x36d   : > { %1555 = vmatmul.mubr.msk.f32.vlgmr.msra.gmra.mrb[0].mxu0 %vm1174_vm5, %v1262_v14 }
 0x440   : > { %v1338_v16 = vpop.f32.mrb[0].mxu0 }
 0x441   : > { %v1339_v17 = vadd.f32 %v1338_v16, %v1268_v15  ;;  %v1556_v18 = vpop.f32.mrb[1].mxu0 }
 0x443   : > { %1343 = vst.msk [vmem:[%s1920_s10] sm:$0x3] %vm1342_vm8, %v1339_v17 }
 0x444 PF: > { %p18_p11 = scmp.ge.s32.totalorder %s1751_s18, 4   ;;  %s1921_s15 = smov %s1652_s16 }
 0x445   : > { %s1922_s16 = smov %s1760_s21  ;;  %s1923_s17 = smov %s1751_s18 }
 0x446   :  { %20 = sbr.rel (!%p18_p11) target bundleno = 4 (0x4), region = 152 }

</bundles_post_ra>
